<compile_context>
chip_gen: v6e
topology: v6e:2x2x1
jax: 0.10.0
libtpu: 0.0.40
codegen_flags: <defaults>
</compile_context>

<pallas_src>
import math

import jax
import jax.numpy as jnp
from jax import lax
from jax.experimental import pallas as pl
from jax.experimental.pallas import tpu as pltpu

_LANE = 128


def _round_up(n, m):
    return ((n + m - 1) // m) * m


def _vmem_capacity_bytes():
    # 128 MiB on v5e/v6e, 64 MiB per TensorCore on v7x.  Conservative fallback.
    try:
        return int(pltpu.get_tpu_info().vmem_capacity_bytes)
    except Exception:
        return 64 << 20


def _decoder_kernel(x_ref, w_ref, b_ref, o_ref):
    # x_ref : (TM, units)          -- streamed row tile of the flattened input
    # w_ref : (num_classes, units) -- whole weight, VMEM-resident across steps
    # b_ref : (1, num_classes)     -- VMEM-resident bias
    # o_ref : (TM, num_classes)    -- output tile (written directly, no wrapper transpose)
    acc = lax.dot_general(
        x_ref[...], w_ref[...],
        dimension_numbers=(((1,), (1,)), ((), ())),   # contract on `units`
        preferred_element_type=jnp.float32,
    )
    o_ref[...] = (acc + b_ref[...]).astype(o_ref.dtype)


def _pick_row_tile(M, units, num_classes, itemsize, vmem_cap):
    """Pick TM (rows per grid step) against the lane-padded VMEM footprint."""
    if M <= 4096:
        # Single full-extent block: always layout-legal, fits easily in VMEM.
        return M
    # Padded VMEM bytes per row per buffer: x block + out block, each padded
    # to a multiple of 128 lanes.
    per_row = (_round_up(units, _LANE) + _round_up(num_classes, _LANE)) * itemsize
    budget = min(vmem_cap // 2, 48 << 20)       # leave headroom for compiler scratch
    tm = budget // (2 * per_row)                # 2 = default double-buffering
    tm = min(tm, 32768)
    # Keep >= ~8 row tiles for big M: both v7x TensorCores stay fed and the
    # DMA pipeline keeps depth.
    tm = min(tm, max(_round_up(pl.cdiv(M, 8), 512), 4096))
    tm = max(512, (tm // 512) * 512)            # sublane-aligned (multiple of 8)
    return tm


def one_shot_rnn_decoder(x, W, b):
    """Equivalent of OneShotRNNDecoder.forward: self.W(x), W: (num_classes, units)."""
    num_classes, units = W.shape
    assert x.shape[-1] == units

    lead_shape = x.shape[:-1]
    M = int(math.prod(lead_shape)) if lead_shape else 1

    x2d = x.reshape(M, units)
    b2d = b.reshape(1, num_classes)
    itemsize = x2d.dtype.itemsize

    vmem_cap = _vmem_capacity_bytes()
    TM = _pick_row_tile(M, units, num_classes, itemsize, vmem_cap)
    grid_m = pl.cdiv(M, TM)

    # Size the scoped-VMEM limit to the actual padded, double-buffered blocks
    # (+ slack for W/b buffers and compiler internal scratch).
    per_row = (_round_up(units, _LANE) + _round_up(num_classes, _LANE)) * itemsize
    needed = 2 * TM * per_row + (4 << 20)
    vmem_limit = int(min(max(needed, 32 << 20), vmem_cap - (8 << 20)))

    cost = pl.CostEstimate(
        flops=2 * M * units * num_classes,
        transcendentals=0,
        bytes_accessed=itemsize * (M * units + num_classes * units + num_classes)
        + itemsize * M * num_classes,
    )

    out = pl.pallas_call(
        _decoder_kernel,
        out_shape=jax.ShapeDtypeStruct((M, num_classes), x.dtype),
        grid_spec=pltpu.PrefetchScalarGridSpec(
            num_scalar_prefetch=0,
            grid=(grid_m,),
            in_specs=[
                pl.BlockSpec((TM, units), lambda i: (i, 0)),           # streamed x tiles
                pl.BlockSpec((num_classes, units), lambda i: (0, 0)),  # resident W
                pl.BlockSpec((1, num_classes), lambda i: (0, 0)),      # resident b
            ],
            out_specs=pl.BlockSpec((TM, num_classes), lambda i: (i, 0)),
        ),
        compiler_params=pltpu.CompilerParams(
            dimension_semantics=("parallel",),   # shard row tiles across TCs (v7x)
            vmem_limit_bytes=vmem_limit,
        ),
        cost_estimate=cost,
    )(x2d, W, b2d)

    # Free view back to the original leading dims.
    return out.reshape(*lead_shape, num_classes)


if __name__ == "__main__":
    units = 32
    num_classes = 2
    batch, seq = 2, 8

    key = jax.random.PRNGKey(0)
    k_x, k_w, k_b, k_x2 = jax.random.split(key, 4)

    # Deterministic parameter init (mimicking nn.Linear's uniform(-1/sqrt(units), 1/sqrt(units)))
    bound = 1.0 / (units ** 0.5)
    W = jax.random.uniform(k_w, (num_classes, units), jnp.float32, -bound, bound)
    b = jax.random.uniform(k_b, (num_classes,), jnp.float32, -bound, bound)

    # Small 3-D case (single-block path).
    x = jax.random.normal(k_x, (batch, seq, units), jnp.float32)
    y = jax.block_until_ready(one_shot_rnn_decoder(x, W, b))
    y_ref = x @ W.T + b
    assert y.shape == (batch, seq, num_classes)
    assert jnp.allclose(y, y_ref, atol=1e-5, rtol=1e-5)

    # Larger 2-D case exercising the tiled grid (grid > 1, ragged last tile).
    x2 = jax.random.normal(k_x2, (4113, units), jnp.float32)
    y2 = jax.block_until_ready(one_shot_rnn_decoder(x2, W, b))
    y2_ref = x2 @ W.T + b
    assert y2.shape == (4113, num_classes)
    assert jnp.allclose(y2, y2_ref, atol=1e-5, rtol=1e-5)

    print("KERNEL_OK")
</pallas_src>

<mosaic_0001>
module attributes {stable_mosaic.version = 11 : i64} {
  func.func @_decoder_kernel(%arg0: i32, %arg1: memref<16x32xf32, #tpu.memory_space<vmem>>, %arg2: memref<2x32xf32, #tpu.memory_space<vmem>>, %arg3: memref<1x2xf32, #tpu.memory_space<vmem>>, %arg4: memref<16x2xf32, #tpu.memory_space<vmem>>) attributes {dimension_semantics = [#tpu.dimension_semantics<parallel>], iteration_bounds = array<i64: 1>, scalar_prefetch = 0 : i64, scratch_operands = 0 : i64, tpu.core_type = #tpu.core_type<tc>, window_params = [{transform_indices = @transform_0, window_bounds = array<i64: 16, 32>}, {pipeline_mode = #tpu.pipeline_mode<synchronous>, transform_indices = @transform_1, window_bounds = array<i64: 2, 32>}, {pipeline_mode = #tpu.pipeline_mode<synchronous>, transform_indices = @transform_2, window_bounds = array<i64: 1, 2>}, {transform_indices = @transform_3, window_bounds = array<i64: 16, 2>}]} {
    %c0 = arith.constant 0 : index
    %c0_0 = arith.constant 0 : index
    %0 = vector.load %arg1[%c0, %c0_0] : memref<16x32xf32, #tpu.memory_space<vmem>>, vector<16x32xf32>
    %c0_1 = arith.constant 0 : index
    %c0_2 = arith.constant 0 : index
    %1 = vector.load %arg2[%c0_1, %c0_2] : memref<2x32xf32, #tpu.memory_space<vmem>>, vector<2x32xf32>
    %cst = arith.constant dense<0.000000e+00> : vector<16x2xf32>
    %2 = tpu.matmul %0, %1, %cst {dimension_numbers = #tpu.dot_dimension_numbers<[1], [1], [0], [0], [0, 0, 1, 0], [], []>} : vector<16x32xf32>, vector<2x32xf32>, vector<16x2xf32> -> vector<16x2xf32>
    %c0_3 = arith.constant 0 : index
    %c0_4 = arith.constant 0 : index
    %3 = vector.load %arg3[%c0_3, %c0_4] : memref<1x2xf32, #tpu.memory_space<vmem>>, vector<1x2xf32>
    %4 = vector.broadcast %3 : vector<1x2xf32> to vector<16x2xf32>
    %5 = arith.addf %2, %4 : vector<16x2xf32>
    %c0_5 = arith.constant 0 : index
    %c0_6 = arith.constant 0 : index
    %6 = vector.load %arg4[%c0_5, %c0_6] : memref<16x2xf32, #tpu.memory_space<vmem>>, vector<16x2xf32>
    tpu.vector_store %arg4[%c0_5, %c0_6], %5 {strides = array<i32>} : memref<16x2xf32, #tpu.memory_space<vmem>>, vector<16x2xf32>,
    return
  }
  func.func @transform_0(%arg0: i32) -> (i32, i32) {
    %c0_i32 = arith.constant 0 : i32
    %c0_i32_0 = arith.constant 0 : i32
    return %arg0, %c0_i32 : i32, i32
  }
  func.func @transform_1(%arg0: i32) -> (i32, i32) {
    %c0_i32 = arith.constant 0 : i32
    %c0_i32_0 = arith.constant 0 : i32
    %c0_i32_1 = arith.constant 0 : i32
    return %c0_i32, %c0_i32_0 : i32, i32
  }
  func.func @transform_2(%arg0: i32) -> (i32, i32) {
    %c0_i32 = arith.constant 0 : i32
    %c0_i32_0 = arith.constant 0 : i32
    %c0_i32_1 = arith.constant 0 : i32
    return %c0_i32, %c0_i32_0 : i32, i32
  }
  func.func @transform_3(%arg0: i32) -> (i32, i32) {
    %c0_i32 = arith.constant 0 : i32
    %c0_i32_0 = arith.constant 0 : i32
    return %arg0, %c0_i32 : i32, i32
  }
}

</mosaic_0001>

<bundles_post_ra>
// kernel: tpu_custom_call.1
= control target key start
LH: loop header
LB: loop body
LE: loop exit
PB: predicated region body
PF: predicated region fallthrough
CT: control target
= control target key end

     0   :  { %8 = vsyncpa [#allocation3], 0  ;;  %s243_s0 = inlined_call_operand.hbm [shape: f32[16,32], index: 0, kind: input, shape index: {}]   ;;  %s244_s1 = inlined_call_operand.hbm [shape: f32[2,32], index: 1, kind: input, shape index: {}]   ;;  %s245_s2 = inlined_call_operand.vmem [shape: f32[1,2], index: 2, kind: input, shape index: {}]   ;;  %s246_s3 = inlined_call_operand.vmem [shape: f32[16,2], index: 3, kind: output, shape index: {}]  }
   0x1   :  { %9 = vsyncpa [#allocation5], 0  ;;  %s204_s12 = smov [#allocation2]  }
   0x2   :  { %s15_s13 = sshll.u32 %s204_s12, 4  ;;  %s16_s13 = int_to_ptr.vmem [resolvable:$true] %s15_s13 }
   0x3   :  { %s168_s14 = scalar_lea.vmem %s16_s13, 256  ;;  %p173_p1 = scmp.lt.s32.totalorder %s16_s13, %s16_s13 }
   0x4   :  { %p169_p0 = scmp.ne.s32.totalorder %s16_s13, %s168_s14  ;;  %p174_p2 = scmp.lt.s32.totalorder %s168_s14, %s168_s14 }
   0x6   :  { %p175_p3 = por %p174_p2, %p173_p1 }
   0x8   :  { %p176_p4 = pnand %p175_p3, %p169_p0 }
   0xa   :  { %179 = shalt.err (!%p176_p4)
}
   0xb   :  { %s205_s15 = smov 128   ;;  %s206_s16 = smov 8  }
   0xc   :  { %21 = dma.hbm_to_vmem [thread:$0]  %s243_s0, 256, %s16_s13, [#allocation3], %s205_s15, %s205_s15, %s206_s16  }
   0xd   :  { %s207_s19 = smov [#allocation4]  }
   0xe   :  { %s28_s20 = sshll.u32 %s207_s19, 4  ;;  %s29_s20 = int_to_ptr.vmem [resolvable:$true] %s28_s20 }
   0xf   :  { %s188_s21 = scalar_lea.vmem %s29_s20, 32  ;;  %p193_p6 = scmp.lt.s32.totalorder %s29_s20, %s29_s20 }
  0x10   :  { %p189_p5 = scmp.ne.s32.totalorder %s29_s20, %s188_s21  ;;  %p194_p7 = scmp.lt.s32.totalorder %s188_s21, %s188_s21 }
  0x12   :  { %p195_p8 = por %p194_p7, %p193_p6 }
  0x14   :  { %p196_p9 = pnand %p195_p8, %p189_p5 }
  0x16   :  { %199 = shalt.err (!%p196_p9)
}
  0x17   :  { %31 = dma.hbm_to_vmem [thread:$0]  %s244_s1, 32, %s29_s20, [#allocation5]  }
  0x18   :  { %200 = dma.done.wait [#allocation3], 256  }
  0x19   :  { %201 = vsyncadd [#allocation3], 4294967040 }
  0x1a   :  { %202 = dma.done.wait [#allocation5], 32  }
  0x1b   :  { %203 = vsyncadd [#allocation5], 4294967264  ;;  %vm50_vm0 = vcmask 261120   ;;  %v42_v0 = vld [vmem:[#allocation4] sm:$0x3]  ;;  %v40_v1 = vld [vmem:[#allocation2] sm:$0xff] }
  0x1c   :  { %151 = vmatprep.subr.msk.mxu0 %vm50_vm0, %v42_v0  ;;  %153 = vmatprep.mubr.msk.f32.mxu0 %vm50_vm0, %v40_v1  ;;  %v41_v2 = vld [vmem:[#allocation2 + $0x8] sm:$0xff]  ;;  %v144_v3 = vld [vmem:[%s245_s2] ss:$0 sm:$0xff]  ;;  %vm135_vm1 = vcmask 15360  }
  0x1d   :  { %152 = vmatpush3.xpose.msk.msra.mxu0 %vm50_vm0, %v42_v0 }
  0x20   :  { %154 = vmatmul.mubr.msk.f32.vlgmr.msra.gmra.mxu0 %vm50_vm0, %v41_v2 }
  0xe0   :  { %v155_v4 = vpop.f32.mrf.mxu0 }
  0xe1   :  { %v132_v5 = vadd.f32 %v155_v4, %v144_v3 }
  0xe2   :  { %v126_v6 = vpop.f32.mrf.mxu0 }
  0xe3   :  { %137 = vst.msk [vmem:[%s246_s3 + $0x8] sm:$0xff] %vm135_vm1, %v132_v5  ;;  %v127_v7 = vadd.f32 %v144_v3, %v126_v6 }
  0xe5   :  { %136 = vst.msk [vmem:[%s246_s3] sm:$0xff] %vm135_vm1, %v127_v7 }
  0xe6   :  { %142 = vsyncpa [#allocation3], 1 }
  0xe7   :  { %143 = vsyncpa [#allocation5], 1 }

</bundles_post_ra>
